<compile_context>
chip_gen: v7x
topology: tpu7x:2x2x1
jax: 0.10.0
libtpu: 0.0.40
codegen_flags: <defaults>
</compile_context>

<pallas_src>
import jax
import jax.numpy as jnp
from jax.experimental import pallas as pl
from jax.experimental.pallas import tpu as pltpu

_ITEMSIZE = 4  # float32


def threshold_kernel(thr_ref, f1_ref, f2_ref, out_ref):
    # thr_ref: SMEM (4,) = [t1_low, t1_high, t2_low, t2_high]; loop-invariant.
    t1_lo = thr_ref[0]
    t1_hi = thr_ref[1]
    t2_lo = thr_ref[2]
    t2_hi = thr_ref[3]

    f1 = f1_ref[...]
    f2 = f2_ref[...]

    within1 = (f1 >= t1_lo) & (f1 <= t1_hi)
    within2 = (f2 >= t2_lo) & (f2 <= t2_hi)
    within = within1 & within2

    out_ref[...] = 1.0 - within.astype(out_ref.dtype)


def _threshold_jnp(f1, f2, thr):
    w1 = (f1 >= thr[0]) & (f1 <= thr[1])
    w2 = (f2 >= thr[2]) & (f2 <= thr[3])
    return 1.0 - (w1 & w2).astype(jnp.float32)


def _largest_divisor_multiple(n, base, cap):
    """Largest multiple of `base` that divides n and is <= cap. 0 if none."""
    best = 0
    m = base
    cap = min(cap, n)
    while m <= cap:
        if n % m == 0:
            best = m
        m += base
    return best


def _block_budget():
    """(per-array block bytes, explicit scoped-VMEM limit), generation-aware.

    3 arrays x 2 pipeline buffers x block must stay under the scoped VMEM
    limit with headroom.  4 MiB blocks (24 MiB resident, 32 MiB limit) are
    safe everywhere incl. v7x (64 MiB physical VMEM/TC); on 128-MiB parts
    (v5e/v6e) we can afford 5 MiB blocks with a 40 MiB limit.
    """
    block_bytes = 4 << 20
    vmem_limit = 32 << 20
    try:  # best-effort trace-time hardware query
        info = pltpu.get_tpu_info()
        cap = getattr(info, "vmem_capacity_bytes", None)
        if cap is not None and cap >= (100 << 20):
            block_bytes = 5 << 20
            vmem_limit = 40 << 20
    except Exception:
        pass
    return block_bytes, vmem_limit


def _run_threshold(f1_2d, f2_2d, thresholds, tm, lane, grid_len, vmem_limit):
    M = f1_2d.shape[0]
    n = M * lane
    cost = pl.CostEstimate(
        flops=5 * n,                       # 4 compares + combine/sub (VPU)
        transcendentals=0,
        bytes_accessed=3 * n * _ITEMSIZE,  # 2 f32 reads + 1 f32 write
    )
    return pl.pallas_call(
        threshold_kernel,
        out_shape=jax.ShapeDtypeStruct((M, lane), jnp.float32),
        grid_spec=pltpu.PrefetchScalarGridSpec(
            num_scalar_prefetch=0,
            grid=(grid_len,),
            in_specs=[
                # Thresholds stay a whole-array SMEM operand; the four scalar
                # reads are loop-invariant and this path is verified on HW.
                pl.BlockSpec(memory_space=pltpu.SMEM),
                pl.BlockSpec((tm, lane), lambda i: (i, 0)),   # feature1 tile
                pl.BlockSpec((tm, lane), lambda i: (i, 0)),   # feature2 tile
            ],
            out_specs=pl.BlockSpec((tm, lane), lambda i: (i, 0)),
        ),
        compiler_params=pltpu.CompilerParams(
            dimension_semantics=("parallel",),
            vmem_limit_bytes=vmem_limit),
        cost_estimate=cost,
    )(thresholds, f1_2d, f2_2d)


def threshold_layer(feature1, feature2, thresholds, *,
                    max_lane=2048, small_input_elems=1 << 16):
    """ThresholdLayer.forward.

    feature1 / feature2: same arbitrary shape, float32.
    thresholds: (4,) float32 = [t1_low, t1_high, t2_low, t2_high].
    small_input_elems: below this flat size compute in plain jnp (custom-call
      setup dominates and XLA fuses the trivial elementwise op better).
    """
    assert feature1.shape == feature2.shape
    orig_shape = feature1.shape
    n = feature1.size

    # Small-input bypass (also covers n < 128 where no lane-dense tile exists).
    if n < max(small_input_elems, 128):
        return _threshold_jnp(feature1, feature2, thresholds)

    flat1 = feature1.reshape(-1)
    flat2 = feature2.reshape(-1)

    # Kernel runs on the 128-divisible prefix; a tiny (<128-element) plain-jnp
    # epilogue handles the ragged tail (no pad / slice extra HBM passes).
    n_main = (n // 128) * 128
    tail = n - n_main

    # Widest lane dim (multiple of 128, <= max_lane) that divides the prefix:
    # full-width unmasked stores, no padding.
    lane = _largest_divisor_multiple(n_main, 128, max_lane)
    M = n_main // lane

    block_bytes, vmem_limit = _block_budget()
    rows_budget = max(8, (block_bytes // (lane * _ITEMSIZE)) // 8 * 8)

    # Never collapse to a single grid step on a non-trivial working set: the
    # "parallel" grid axis is what lets v7x shard work across both
    # TensorCores (measured-neutral on single-TC v5e/v6e).
    total_in_bytes = n_main * _ITEMSIZE
    if total_in_bytes > (16 << 20):
        min_steps = 8
    elif total_in_bytes > (2 << 20):
        min_steps = 2
    else:
        min_steps = 1
    if min_steps > 1:
        rows_budget = min(rows_budget, max(8, (M // min_steps) // 8 * 8))

    rows_budget = min(rows_budget, M)

    if M <= rows_budget:
        tm = M                         # one block spans the whole prefix
        grid_len = 1
    else:
        tm = _largest_divisor_multiple(M, 8, rows_budget)
        if tm == 0:                    # no divisor: ragged (masked) last block
            tm = max(8, (rows_budget // 8) * 8)
        grid_len = pl.cdiv(M, tm)

    f1_main = flat1 if tail == 0 else flat1[:n_main]
    f2_main = flat2 if tail == 0 else flat2[:n_main]
    out_main = _run_threshold(
        f1_main.reshape(M, lane), f2_main.reshape(M, lane),
        thresholds, tm, lane, grid_len, vmem_limit)

    out_flat = out_main.reshape(-1)
    if tail:
        out_tail = _threshold_jnp(flat1[n_main:], flat2[n_main:], thresholds)
        out_flat = jnp.concatenate([out_flat, out_tail])
    return out_flat.reshape(orig_shape)


if __name__ == "__main__":
    key = jax.random.PRNGKey(0)
    k1, k2, k3, k4 = jax.random.split(key, 4)

    # Deterministic parameter init matching nn.Parameter defaults:
    # threshold1_low=0.0, threshold1_high=1.0, threshold2_low=0.0, threshold2_high=1.0
    thresholds = jnp.array([0.0, 1.0, 0.0, 1.0], dtype=jnp.float32)

    def ref_fn(a, b):
        w1 = (a >= thresholds[0]) & (a <= thresholds[1])
        w2 = (b >= thresholds[2]) & (b <= thresholds[3])
        return 1.0 - (w1 & w2).astype(jnp.float32)

    # Small NCHW-shaped inputs consistent with an image-feature use case.
    B, C, H, W = 2, 4, 16, 16
    f1 = jax.random.normal(k1, (B, C, H, W), dtype=jnp.float32)
    f2 = jax.random.normal(k2, (B, C, H, W), dtype=jnp.float32)

    # (1) Pallas path (bypass disabled so the kernel definitely executes).
    risk = threshold_layer(f1, f2, thresholds, small_input_elems=0)
    risk = jax.block_until_ready(risk)
    assert risk.shape == (B, C, H, W)
    assert risk.dtype == jnp.float32
    assert bool(jnp.all(risk == ref_fn(f1, f2)))

    # (2) Default path: this size takes the small-input jnp bypass.
    risk_small = jax.block_until_ready(threshold_layer(f1, f2, thresholds))
    assert bool(jnp.all(risk_small == ref_fn(f1, f2)))

    # (3) Ragged flat size (not a multiple of 128): prefix kernel + jnp tail.
    g1 = jax.random.normal(k3, (3, 5, 43), dtype=jnp.float32)
    g2 = jax.random.normal(k4, (3, 5, 43), dtype=jnp.float32)
    risk_r = jax.block_until_ready(
        threshold_layer(g1, g2, thresholds, small_input_elems=0))
    assert risk_r.shape == (3, 5, 43)
    assert bool(jnp.all(risk_r == ref_fn(g1, g2)))

    print("KERNEL_OK")
</pallas_src>

<mosaic_0001>
module attributes {stable_mosaic.version = 11 : i64} {
  func.func @threshold_kernel(%arg0: i32, %arg1: memref<4xf32, #tpu.memory_space<smem>>, %arg2: memref<1x2048xf32, #tpu.memory_space<vmem>>, %arg3: memref<1x2048xf32, #tpu.memory_space<vmem>>, %arg4: memref<1x2048xf32, #tpu.memory_space<vmem>>) attributes {dimension_semantics = [#tpu.dimension_semantics<parallel>], iteration_bounds = array<i64: 1>, scalar_prefetch = 0 : i64, scratch_operands = 0 : i64, tpu.core_type = #tpu.core_type<tc>, window_params = [{transform_indices = @transform_0, window_bounds = array<i64: 4>}, {transform_indices = @transform_1, window_bounds = array<i64: 1, 2048>}, {transform_indices = @transform_2, window_bounds = array<i64: 1, 2048>}, {transform_indices = @transform_3, window_bounds = array<i64: 1, 2048>}]} {
    %c0 = arith.constant 0 : index
    %0 = memref.load %arg1[%c0] : memref<4xf32, #tpu.memory_space<smem>>
    %c1 = arith.constant 1 : index
    %1 = memref.load %arg1[%c1] : memref<4xf32, #tpu.memory_space<smem>>
    %c2 = arith.constant 2 : index
    %2 = memref.load %arg1[%c2] : memref<4xf32, #tpu.memory_space<smem>>
    %c3 = arith.constant 3 : index
    %3 = memref.load %arg1[%c3] : memref<4xf32, #tpu.memory_space<smem>>
    %c0_0 = arith.constant 0 : index
    %c0_1 = arith.constant 0 : index
    %4 = vector.load %arg2[%c0_0, %c0_1] : memref<1x2048xf32, #tpu.memory_space<vmem>>, vector<1x2048xf32>
    %c0_2 = arith.constant 0 : index
    %c0_3 = arith.constant 0 : index
    %5 = vector.load %arg3[%c0_2, %c0_3] : memref<1x2048xf32, #tpu.memory_space<vmem>>, vector<1x2048xf32>
    %6 = vector.broadcast %0 : f32 to vector<1x2048xf32>
    %7 = arith.cmpf oge, %4, %6 : vector<1x2048xf32>
    %8 = vector.broadcast %1 : f32 to vector<1x2048xf32>
    %9 = arith.cmpf ole, %4, %8 : vector<1x2048xf32>
    %10 = arith.andi %7, %9 : vector<1x2048xi1>
    %11 = vector.broadcast %2 : f32 to vector<1x2048xf32>
    %12 = arith.cmpf oge, %5, %11 : vector<1x2048xf32>
    %13 = vector.broadcast %3 : f32 to vector<1x2048xf32>
    %14 = arith.cmpf ole, %5, %13 : vector<1x2048xf32>
    %15 = arith.andi %12, %14 : vector<1x2048xi1>
    %16 = arith.andi %10, %15 : vector<1x2048xi1>
    %17 = arith.extui %16 : vector<1x2048xi1> to vector<1x2048xi32>
    %18 = arith.sitofp %17 : vector<1x2048xi32> to vector<1x2048xf32>
    %cst = arith.constant 1.000000e+00 : f32
    %19 = vector.broadcast %cst : f32 to vector<1x2048xf32>
    %20 = arith.subf %19, %18 : vector<1x2048xf32>
    %c0_4 = arith.constant 0 : index
    %c0_5 = arith.constant 0 : index
    %21 = vector.load %arg4[%c0_4, %c0_5] : memref<1x2048xf32, #tpu.memory_space<vmem>>, vector<1x2048xf32>
    tpu.vector_store %arg4[%c0_4, %c0_5], %20 {strides = array<i32>} : memref<1x2048xf32, #tpu.memory_space<vmem>>, vector<1x2048xf32>,
    return
  }
  func.func @transform_0(%arg0: i32) -> i32 {
    %c0_i32 = arith.constant 0 : i32
    %c0_i32_0 = arith.constant 0 : i32
    return %c0_i32 : i32
  }
  func.func @transform_1(%arg0: i32) -> (i32, i32) {
    %c0_i32 = arith.constant 0 : i32
    %c0_i32_0 = arith.constant 0 : i32
    return %arg0, %c0_i32 : i32, i32
  }
  func.func @transform_2(%arg0: i32) -> (i32, i32) {
    %c0_i32 = arith.constant 0 : i32
    %c0_i32_0 = arith.constant 0 : i32
    return %arg0, %c0_i32 : i32, i32
  }
  func.func @transform_3(%arg0: i32) -> (i32, i32) {
    %c0_i32 = arith.constant 0 : i32
    %c0_i32_0 = arith.constant 0 : i32
    return %arg0, %c0_i32 : i32, i32
  }
}

</mosaic_0001>

<bundles_post_ra>
// kernel: tpu_custom_call.1
= control target key start
LH: loop header
LB: loop body
LE: loop exit
PB: predicated region body
PF: predicated region fallthrough
CT: control target
= control target key end

     0   :  { %8 = vsyncpa [#allocation5], 0  ;;  %s268_s0 = inlined_call_operand.hbm [shape: f32[4], index: 0, kind: input, shape index: {}]   ;;  %s269_s1 = inlined_call_operand.hbm [shape: f32[1,2048], index: 1, kind: input, shape index: {}]   ;;  %s270_s2 = inlined_call_operand.hbm [shape: f32[1,2048], index: 2, kind: input, shape index: {}]   ;;  %s271_s3 = inlined_call_operand.hbm [shape: f32[1,2048], index: 3, kind: output, shape index: {}]  }
   0x1   :  { %9 = vsyncpa [#allocation3], 0 }
   0x2   :  { %10 = vsyncpa [#allocation8], 0 }
   0x3   :  { %11 = vsyncpa [#allocation4], 0  ;;  %s111_s14 = scalar_lea.hbm %s268_s0, 16 }
   0x4   :  { %p112_p0 = scmp.ne.s32.totalorder %s268_s0, %s111_s14  ;;  %p115_p1 = scmp.lt.u32.totalorder %s111_s14, %s268_s0 }
   0x6   :  { %p117_p2 = pnand %p115_p1, %p112_p0 }
   0x8   :  { %120 = shalt.err (!%p117_p2)
}
   0x9   :  { %s195_s19 = smov [#allocation2]   ;;  %s196_s22 = smov [#allocation6]  }
   0xa   :  { %19 = dma.hbm_to_smem %s268_s0, 16, %s195_s19, [#allocation5]  }
   0xb   :  { %s26_s23 = sshll.u32 %s196_s22, 4  ;;  %s197_s24 = smov [#allocation7]   ;;  %s27_s23 = int_to_ptr.vmem [resolvable:$true] %s26_s23 }
   0xc   :  { %s36_s25 = sshll.u32 %s197_s24, 4  ;;  %s121_s28 = scalar_lea.hbm %s269_s1, 256  ;;  %s37_s25 = int_to_ptr.vmem [resolvable:$true] %s36_s25 }
   0xd   :  { %p122_p3 = scmp.ne.s32.totalorder %s269_s1, %s121_s28  ;;  %p125_p4 = scmp.lt.u32.totalorder %s121_s28, %s269_s1 }
   0xf   :  { %p127_p5 = pnand %p125_p4, %p122_p3 }
  0x11   :  { %130 = shalt.err (!%p127_p5)
}
  0x12   :  { %s131_s0 = scalar_lea.vmem %s27_s23, 256  ;;  %p136_p7 = scmp.lt.s32.totalorder %s27_s23, %s27_s23 }
  0x13   :  { %p132_p6 = scmp.ne.s32.totalorder %s27_s23, %s131_s0  ;;  %p137_p8 = scmp.lt.s32.totalorder %s131_s0, %s131_s0 }
  0x15   :  { %p138_p9 = por %p137_p8, %p136_p7 }
  0x17   :  { %p139_p10 = pnand %p138_p9, %p132_p6 }
  0x19   :  { %142 = shalt.err (!%p139_p10)
}
  0x1a   :  { %29 = dma.hbm_to_vmem [thread:$0]  %s269_s1, 256, %s27_s23, [#allocation3]  }
  0x1b   :  { %s143_s10 = scalar_lea.hbm %s270_s2, 256 }
  0x1c   :  { %p144_p11 = scmp.ne.s32.totalorder %s270_s2, %s143_s10  ;;  %p147_p12 = scmp.lt.u32.totalorder %s143_s10, %s270_s2 }
  0x1e   :  { %p149_p13 = pnand %p147_p12, %p144_p11 }
  0x20   :  { %152 = shalt.err (!%p149_p13)
}
  0x21   :  { %s153_s15 = scalar_lea.vmem %s37_s25, 256  ;;  %p158_p1 = scmp.lt.s32.totalorder %s37_s25, %s37_s25 }
  0x22   :  { %p154_p0 = scmp.ne.s32.totalorder %s37_s25, %s153_s15  ;;  %p159_p2 = scmp.lt.s32.totalorder %s153_s15, %s153_s15 }
  0x24   :  { %p160_p3 = por %p159_p2, %p158_p1 }
  0x26   :  { %p161_p4 = pnand %p160_p3, %p154_p0 }
  0x28   :  { %164 = shalt.err (!%p161_p4)
}
  0x29   :  { %39 = dma.hbm_to_vmem [thread:$0]  %s270_s2, 256, %s37_s25, [#allocation8]  }
  0x2a   :  { %187 = dma.done.wait [#allocation5], 16  }
  0x2b   :  { %188 = vsyncadd [#allocation5], 4294967280 }
  0x2c   :  { %189 = dma.done.wait [#allocation3], 256  }
  0x2d   :  { %190 = vsyncadd [#allocation3], 4294967040 }
  0x2e   :  { %191 = dma.done.wait [#allocation8], 256  }
  0x2f   :  { %192 = vsyncadd [#allocation8], 4294967040 }
  0x30   :  { %49 = sfence }
  0x31   :  { %s50_s17 = sld [smem:[#allocation2]]  ;;  %s101_s18 = sld [smem:[#allocation2 + $0x1]]  ;;  %v54_v0 = vld [vmem:[#allocation6] sm:$0xff]  ;;  %v56_v1 = vld [vmem:[#allocation7] sm:$0xff]  ;;  %v55_v2 = vld [vmem:[#allocation6 + $0x8] sm:$0xff]  ;;  %v198_v8 = vmov 0.0  }
  0x32   :  { %s102_s19 = sld [smem:[#allocation2 + $0x2]]  ;;  %s103_s20 = sld [smem:[#allocation2 + $0x3]]  ;;  %v57_v5 = vld [vmem:[#allocation7 + $0x8] sm:$0xff] }
  0x33   :  { %s199_s2 = smov [#allocation9]  }
  0x34   :  { %s90_s21 = sshll.u32 %s199_s2, 4  ;;  %s91_s21 = int_to_ptr.vmem [resolvable:$true] %s90_s21 }
  0x35   :  { %s165_s22 = scalar_lea.vmem %s91_s21, 256  ;;  %p170_p6 = scmp.lt.s32.totalorder %s91_s21, %s91_s21 }
  0x36   :  { %p166_p5 = scmp.ne.s32.totalorder %s91_s21, %s165_s22  ;;  %p171_p7 = scmp.lt.s32.totalorder %s165_s22, %s165_s22 }
  0x37   :  { %v58_v3 = vstv %s50_s17  ;;  %v61_v4 = vstv %s101_s18 }
  0x38   :  { %vm59_vm0 = vcmp.ge.f32.partialorder %v54_v0, %v58_v3  ;;  %vm62_vm1 = vcmp.le.f32.partialorder %v54_v0, %v61_v4  ;;  %v66_v6 = vstv %s102_s19  ;;  %v69_v7 = vstv %s103_s20  ;;  %p172_p8 = por %p171_p7, %p170_p6 }
  0x39   :  { %vm64_vm2 = vmand %vm59_vm0, %vm62_vm1  ;;  %vm67_vm3 = vcmp.ge.f32.partialorder %v56_v1, %v66_v6  ;;  %vm70_vm4 = vcmp.le.f32.partialorder %v56_v1, %v69_v7  ;;  %vm60_vm5 = vcmp.ge.f32.partialorder %v55_v2, %v58_v3  ;;  %vm63_vm6 = vcmp.le.f32.partialorder %v55_v2, %v61_v4 }
  0x3a   :  { %vm72_vm7 = vmand %vm67_vm3, %vm70_vm4  ;;  %vm68_vm8 = vcmp.ge.f32.partialorder %v57_v5, %v66_v6  ;;  %vm71_vm9 = vcmp.le.f32.partialorder %v57_v5, %v69_v7  ;;  %p173_p9 = pnand %p172_p8, %p166_p5 }
  0x3b   :  { %vm74_vm10 = vmand %vm64_vm2, %vm72_vm7 }
  0x3c   :  { %v104_v9 = vsel %vm74_vm10, 1.0, %v198_v8  ;;  %vm65_vm11 = vmand %vm60_vm5, %vm63_vm6 }
  0x3d   :  { %v80_v10 = vsub.f32 1.0, %v104_v9  ;;  %vm73_vm12 = vmand %vm68_vm8, %vm71_vm9 }
  0x3e   :  { %vm75_vm13 = vmand %vm65_vm11, %vm73_vm12 }
  0x3f   :  { %82 = vst [vmem:[#allocation9] sm:$0xff] %v80_v10  ;;  %v105_v11 = vsel %vm75_vm13, 1.0, %v198_v8 }
  0x40   :  { %v81_v12 = vsub.f32 1.0, %v105_v11 }
  0x42   :  { %83 = vst [vmem:[#allocation9 + $0x8] sm:$0xff] %v81_v12 }
  0x43   :  { %176 = shalt.err (!%p173_p9)
}
  0x44   :  { %s177_s25 = scalar_lea.hbm %s271_s3, 256 }
  0x45   :  { %p178_p10 = scmp.ne.s32.totalorder %s271_s3, %s177_s25  ;;  %p181_p11 = scmp.lt.u32.totalorder %s177_s25, %s271_s3 }
  0x47   :  { %p183_p12 = pnand %p181_p11, %p178_p10 }
  0x49   :  { %186 = shalt.err (!%p183_p12)
}
  0x4a   :  { %93 = dma.vmem_to_hbm [thread:$0]  %s91_s21, 256, %s271_s3, [#allocation4]  }
  0x4b   :  { %193 = dma.done.wait [#allocation4], 256  }
  0x4c   :  { %194 = vsyncadd [#allocation4], 4294967040 }
  0x4d   :  { %97 = vsyncpa [#allocation3], 1 }
  0x4e   :  { %98 = vsyncpa [#allocation8], 1 }
  0x4f   :  { %99 = vsyncpa [#allocation4], 1 }
  0x50   :  { %100 = vsyncpa [#allocation5], 1 }

</bundles_post_ra>
